<compile_context>
chip_gen: v5e
topology: v5e:2x2
jax: 0.10.0
libtpu: 0.0.40
codegen_flags: <defaults>
</compile_context>

<pallas_src>
import math

import jax
import jax.numpy as jnp
from jax import lax
from jax.experimental import pallas as pl
from jax.experimental.pallas import tpu as pltpu

HIDDEN = 64
N_COMPONENTS = 4  # -> MLP output size 3 * N_COMPONENTS

_INV_SQRT2 = 1.0 / math.sqrt(2.0)
_INV_SQRT_2PI = 1.0 / math.sqrt(2.0 * math.pi)
_NEG_BIG = -1e30  # kills softmax weight of padded (dummy) mixture components


def _round_up(v, m):
    return ((v + m - 1) // m) * m


def _cflow_kernel(xc_ref, w01_ref, b01_ref, w2_ref, b2_ref, w3_ref, b3_ref, out_ref):
    """Transposed layout: batch on lanes, hidden units / mixture components on sublanes."""
    kp = w3_ref.shape[0] // 3          # padded component count per chunk (multiple of 8)
    mxu_dt = w2_ref.dtype              # bf16 by default, f32 for the exact path

    xc = xc_ref[...]                   # (2, TM): row 0 = x, row 1 = condition
    x = xc[0:1, :]                     # (1, TM)
    c = xc[1:2, :]                     # (1, TM)

    # Layers 0+1 fused (no ReLU between them): h = relu(w01^T * c + b01^T)  -> (64, TM)
    h = jnp.maximum(w01_ref[...] * c + b01_ref[...], 0.0)

    # Layer 2: relu(W2^T @ h + b2^T) — MXU dot, bf16 operands, f32 accumulate -> (64, TM)
    h = jnp.maximum(
        jnp.dot(w2_ref[...], h.astype(mxu_dt), preferred_element_type=jnp.float32)
        + b2_ref[...], 0.0)

    # Layer 3 (output padded to 3*kp sublane-aligned rows)                   -> (3*kp, TM)
    p = jnp.dot(w3_ref[...], h.astype(mxu_dt), preferred_element_type=jnp.float32) \
        + b3_ref[...]

    mus = p[0:kp, :]                   # (kp, TM)   rows >= K are zero-weight dummies
    log_sigmas = p[kp:2 * kp, :]       # (kp, TM)
    wl = p[2 * kp:3 * kp, :]           # (kp, TM)   dummy rows biased to -1e30 (f32 path)

    # Softmax over components (sublane axis). Approx reciprocal runs on the EUP; one
    # Newton step restores full f32 accuracy so sum(weights) == 1 to ~1 ulp.
    wl_max = jnp.max(wl, axis=0, keepdims=True)
    e = jnp.exp(wl - wl_max)
    s = jnp.sum(e, axis=0, keepdims=True)
    inv = pl.reciprocal(s, approx=True)
    inv = inv * (2.0 - s * inv)
    weights = e * inv

    # Mixture CDF / PDF, strength-reduced (no divides; t reused for erf and pdf).
    # NOTE: erf stays on the VPU polynomial path; an EUP tanh-CDF approximation is only
    # worth it if a bundle dump shows VALU as the binding slot after the bf16 change.
    inv_sigma = jnp.exp(-log_sigmas)
    t = (x - mus) * inv_sigma
    cdf = 0.5 * (1.0 + lax.erf(t * _INV_SQRT2))
    pdf = jnp.exp(-0.5 * (t * t)) * inv_sigma * _INV_SQRT_2PI

    z = jnp.sum(cdf * weights, axis=0, keepdims=True)           # (1, TM)
    dz = jnp.sum(pdf * weights, axis=0, keepdims=True)          # (1, TM)
    out_ref[...] = jnp.concatenate([z, dz], axis=0)             # one 2-sublane dense store


def init_params(key, n_components=N_COMPONENTS, hidden=HIDDEN):
    """Deterministic synthetic parameters matching CDFParams' layer shapes."""
    ks = jax.random.split(key, 8)
    out = 3 * n_components

    def lin(kw, kb, fan_in, fan_out, scale):
        w = scale * jax.random.normal(kw, (fan_in, fan_out), jnp.float32)
        b = scale * jax.random.normal(kb, (1, fan_out), jnp.float32)
        return w, b

    w0, b0 = lin(ks[0], ks[1], 1, hidden, 0.3)
    w1, b1 = lin(ks[2], ks[3], hidden, hidden, 0.3)
    w2, b2 = lin(ks[4], ks[5], hidden, hidden, 0.3)
    # Smaller output-layer init keeps the mixture's log-sigmas / logits in the range a
    # trained flow would produce and bounds the 1/sigma amplification of operand-rounding
    # error when validating the bf16 fast path against the f32 reference.
    w3, b3 = lin(ks[6], ks[7], hidden, out, 0.1)
    return (w0, b0, w1, b1, w2, b2, w3, b3)


def _prepare_params(params, n_components, mxu_dtype):
    """Fold layers 0+1, transpose everything, pad the output layer to 8-aligned chunks."""
    w0, b0, w1, b1, w2, b2, w3, b3 = params
    hidden = w1.shape[0]
    k = n_components
    kp = _round_up(k, 8)

    # Fuse Linear(1,64) and Linear(64,64) (no activation in between) -> VPU affine.
    w01 = w0 @ w1                       # (1, hidden)
    b01 = b0 @ w1 + b1                  # (1, hidden)

    w01T = w01.T.astype(jnp.float32)            # (hidden, 1)
    b01T = b01.T.astype(jnp.float32)            # (hidden, 1)
    w2T = w2.T.astype(mxu_dtype)                # (hidden, hidden)  MXU operand dtype
    b2T = b2.T.astype(jnp.float32)              # (hidden, 1)

    # Padded, transposed output layer: rows [chunk*kp : chunk*kp + k] hold real params.
    w3T = jnp.zeros((3 * kp, hidden), jnp.float32)
    b3T = jnp.zeros((3 * kp, 1), jnp.float32)
    for chunk in range(3):
        w3T = w3T.at[chunk * kp:chunk * kp + k, :].set(
            w3[:, chunk * k:(chunk + 1) * k].T.astype(jnp.float32))
        b3T = b3T.at[chunk * kp:chunk * kp + k, 0].set(
            b3[0, chunk * k:(chunk + 1) * k].astype(jnp.float32))
    # Dummy weight-logit rows -> huge negative f32 bias -> softmax weight exactly 0.
    b3T = b3T.at[2 * kp + k:3 * kp, 0].set(_NEG_BIG)
    w3T = w3T.astype(mxu_dtype)                 # (3*kp, hidden)  MXU operand dtype

    return w01T, b01T, w2T, b2T, w3T, b3T, kp


def conditional_flow_1d(x, condition, params, n_components=N_COMPONENTS,
                        block_rows=8192, mxu_dtype=jnp.bfloat16):
    """Pallas implementation of ConditionalFlow1D.forward(x, condition) -> (z, dz_by_dx)."""
    x1 = x.reshape(-1).astype(jnp.float32)            # x.view(-1, 1) -> flat batch
    c1 = condition.reshape(-1).astype(jnp.float32)    # condition is (N, 1)
    n = c1.shape[0]
    assert x1.shape[0] == n

    w01T, b01T, w2T, b2T, w3T, b3T, kp = _prepare_params(params, n_components, mxu_dtype)
    hidden = w2T.shape[0]

    # Batch tiling: TM on the lane axis, multiple of 128.  Cap TM at ~n/2 so the grid has
    # at least two steps whenever possible (both v7x TensorCores get work).
    block_rows = max(128, _round_up(block_rows, 128))
    half = max(128, _round_up(pl.cdiv(n, 2), 128))
    tm = min(block_rows, half)
    n_pad = _round_up(n, tm)
    grid = (n_pad // tm,)

    # Merge x and condition into one (2, n_pad) slab: one input DMA per grid step.
    xc = jnp.zeros((2, n_pad), jnp.float32)
    xc = xc.at[0, :n].set(x1).at[1, :n].set(c1)

    tile = lambda i: (0, i)    # batch-tiled arrays
    const = lambda i: (0, 0)   # resident weights / biases (block index never changes)

    wbytes = int(w2T.size * w2T.dtype.itemsize + w3T.size * w3T.dtype.itemsize
                 + 4 * (3 * hidden + 3 * kp))
    flops = int(n_pad * (2 * hidden * hidden + 2 * 3 * kp * hidden + 4 * hidden + 40 * kp))
    transc = int(n_pad * (4 * kp + 1))
    nbytes = int(16 * n_pad + wbytes)

    out = pl.pallas_call(
        _cflow_kernel,
        grid=grid,
        out_shape=jax.ShapeDtypeStruct((2, n_pad), jnp.float32),
        in_specs=[
            pl.BlockSpec((2, tm), tile),               # [x ; condition] (transposed)
            pl.BlockSpec((hidden, 1), const),          # w01^T (fused layers 0+1)
            pl.BlockSpec((hidden, 1), const),          # b01^T
            pl.BlockSpec((hidden, hidden), const),     # w2^T  (mxu_dtype)
            pl.BlockSpec((hidden, 1), const),          # b2^T
            pl.BlockSpec((3 * kp, hidden), const),     # w3^T  (padded, mxu_dtype)
            pl.BlockSpec((3 * kp, 1), const),          # b3^T  (padded, f32)
        ],
        out_specs=pl.BlockSpec((2, tm), tile),         # [z ; dz] (transposed)
        compiler_params=pltpu.CompilerParams(
            dimension_semantics=("parallel",),
            vmem_limit_bytes=48 * 1024 * 1024),
        cost_estimate=pl.CostEstimate(flops=flops, transcendentals=transc,
                                      bytes_accessed=nbytes),
    )(xc, w01T, b01T, w2T, b2T, w3T, b3T)

    # Drop the batch padding.
    return out[0, :n], out[1, :n]


def _reference(x, condition, params):
    """Pure-JAX reference (mirrors the PyTorch forward exactly, all f32)."""
    w0, b0, w1, b1, w2, b2, w3, b3 = params
    x2 = x.reshape(-1, 1)
    h = condition @ w0 + b0
    h = h @ w1 + b1
    h = jnp.maximum(h, 0.0)
    h = h @ w2 + b2
    h = jnp.maximum(h, 0.0)
    p = h @ w3 + b3
    k = p.shape[1] // 3
    mus, log_sigmas, wl = p[:, :k], p[:, k:2 * k], p[:, 2 * k:]
    weights = jax.nn.softmax(wl, axis=1)
    sigma = jnp.exp(log_sigmas)
    diff = x2 - mus
    cdf = 0.5 * (1.0 + jax.scipy.special.erf(diff / (sigma * math.sqrt(2.0))))
    z = jnp.sum(cdf * weights, axis=1)
    log_prob = -0.5 * (diff / sigma) ** 2 - log_sigmas - 0.5 * math.log(2.0 * math.pi)
    dz = jnp.sum(jnp.exp(log_prob) * weights, axis=1)
    return z, dz


if __name__ == "__main__":
    key = jax.random.PRNGKey(0)
    kx, kc, kparam = jax.random.split(key, 3)

    N = 200  # deliberately not a multiple of 128: exercises padding + the 2-step grid split
    x = jax.random.normal(kx, (N,), jnp.float32)
    condition = jax.random.normal(kc, (N, 1), jnp.float32)
    params = init_params(kparam)

    z_ref, dz_ref = _reference(x, condition, params)

    # 1) Exact-arithmetic path (f32 MXU operands): proves the kernel matches the PyTorch
    #    forward semantics tightly.
    z32, dz32 = conditional_flow_1d(x, condition, params, mxu_dtype=jnp.float32)
    jax.block_until_ready((z32, dz32))
    assert z32.shape == (N,) and dz32.shape == (N,)
    assert jnp.allclose(z32, z_ref, atol=2e-3, rtol=2e-3), float(jnp.max(jnp.abs(z32 - z_ref)))
    assert jnp.allclose(dz32, dz_ref, atol=2e-3, rtol=2e-3), float(jnp.max(jnp.abs(dz32 - dz_ref)))

    # 2) Default fast path (bf16 MXU operands, f32 accumulate): validated against the f32
    #    reference within a bf16 operand-rounding error budget (mixture params carry ~1e-2
    #    absolute error which the CDF/PDF can amplify by ~1/sigma).
    z, dz = conditional_flow_1d(x, condition, params)
    jax.block_until_ready((z, dz))
    assert z.shape == (N,) and dz.shape == (N,)
    assert jnp.allclose(z, z_ref, atol=2e-2, rtol=2e-2), float(jnp.max(jnp.abs(z - z_ref)))
    assert jnp.allclose(dz, dz_ref, atol=2e-2, rtol=1e-1), float(jnp.max(jnp.abs(dz - dz_ref)))

    print("KERNEL_OK")
</pallas_src>

<mosaic_0001>
module attributes {stable_mosaic.version = 11 : i64} {
  func.func @_cflow_kernel(%arg0: i32, %arg1: memref<2x128xf32, #tpu.memory_space<vmem>>, %arg2: memref<64x1xf32, #tpu.memory_space<vmem>>, %arg3: memref<64x1xf32, #tpu.memory_space<vmem>>, %arg4: memref<64x64xf32, #tpu.memory_space<vmem>>, %arg5: memref<64x1xf32, #tpu.memory_space<vmem>>, %arg6: memref<24x64xf32, #tpu.memory_space<vmem>>, %arg7: memref<24x1xf32, #tpu.memory_space<vmem>>, %arg8: memref<2x128xf32, #tpu.memory_space<vmem>>) attributes {dimension_semantics = [#tpu.dimension_semantics<parallel>], iteration_bounds = array<i64: 2>, scalar_prefetch = 0 : i64, scratch_operands = 0 : i64, tpu.core_type = #tpu.core_type<tc>, window_params = [{transform_indices = @transform_0, window_bounds = array<i64: 2, 128>}, {pipeline_mode = #tpu.pipeline_mode<synchronous>, transform_indices = @transform_1, window_bounds = array<i64: 64, 1>}, {pipeline_mode = #tpu.pipeline_mode<synchronous>, transform_indices = @transform_2, window_bounds = array<i64: 64, 1>}, {pipeline_mode = #tpu.pipeline_mode<synchronous>, transform_indices = @transform_3, window_bounds = array<i64: 64, 64>}, {pipeline_mode = #tpu.pipeline_mode<synchronous>, transform_indices = @transform_4, window_bounds = array<i64: 64, 1>}, {pipeline_mode = #tpu.pipeline_mode<synchronous>, transform_indices = @transform_5, window_bounds = array<i64: 24, 64>}, {pipeline_mode = #tpu.pipeline_mode<synchronous>, transform_indices = @transform_6, window_bounds = array<i64: 24, 1>}, {transform_indices = @transform_7, window_bounds = array<i64: 2, 128>}]} {
    %c0 = arith.constant 0 : index
    %c0_0 = arith.constant 0 : index
    %0 = vector.load %arg1[%c0, %c0_0] : memref<2x128xf32, #tpu.memory_space<vmem>>, vector<2x128xf32>
    %1 = vector.extract_strided_slice %0 {offsets = [0, 0], sizes = [1, 128], strides = [1, 1]} : vector<2x128xf32> to vector<1x128xf32>
    %2 = vector.extract_strided_slice %0 {offsets = [1, 0], sizes = [1, 128], strides = [1, 1]} : vector<2x128xf32> to vector<1x128xf32>
    %c0_1 = arith.constant 0 : index
    %c0_2 = arith.constant 0 : index
    %3 = vector.load %arg2[%c0_1, %c0_2] : memref<64x1xf32, #tpu.memory_space<vmem>>, vector<64x1xf32>
    %4 = vector.broadcast %3 : vector<64x1xf32> to vector<64x128xf32>
    %5 = vector.broadcast %2 : vector<1x128xf32> to vector<64x128xf32>
    %6 = arith.mulf %4, %5 : vector<64x128xf32>
    %c0_3 = arith.constant 0 : index
    %c0_4 = arith.constant 0 : index
    %7 = vector.load %arg3[%c0_3, %c0_4] : memref<64x1xf32, #tpu.memory_space<vmem>>, vector<64x1xf32>
    %8 = vector.broadcast %7 : vector<64x1xf32> to vector<64x128xf32>
    %9 = arith.addf %6, %8 : vector<64x128xf32>
    %cst = arith.constant 0.000000e+00 : f32
    %10 = vector.broadcast %cst : f32 to vector<64x128xf32>
    %11 = arith.maximumf %9, %10 : vector<64x128xf32>
    %c0_5 = arith.constant 0 : index
    %c0_6 = arith.constant 0 : index
    %12 = vector.load %arg4[%c0_5, %c0_6] : memref<64x64xf32, #tpu.memory_space<vmem>>, vector<64x64xf32>
    %cst_7 = arith.constant dense<0.000000e+00> : vector<64x128xf32>
    %13 = tpu.matmul %12, %11, %cst_7 {dimension_numbers = #tpu.dot_dimension_numbers<[1], [0], [0], [1], [0, 0, 1, 1], [], []>} : vector<64x64xf32>, vector<64x128xf32>, vector<64x128xf32> -> vector<64x128xf32>
    %c0_8 = arith.constant 0 : index
    %c0_9 = arith.constant 0 : index
    %14 = vector.load %arg5[%c0_8, %c0_9] : memref<64x1xf32, #tpu.memory_space<vmem>>, vector<64x1xf32>
    %15 = vector.broadcast %14 : vector<64x1xf32> to vector<64x128xf32>
    %16 = arith.addf %13, %15 : vector<64x128xf32>
    %cst_10 = arith.constant 0.000000e+00 : f32
    %17 = vector.broadcast %cst_10 : f32 to vector<64x128xf32>
    %18 = arith.maximumf %16, %17 : vector<64x128xf32>
    %c0_11 = arith.constant 0 : index
    %c0_12 = arith.constant 0 : index
    %19 = vector.load %arg6[%c0_11, %c0_12] : memref<24x64xf32, #tpu.memory_space<vmem>>, vector<24x64xf32>
    %cst_13 = arith.constant dense<0.000000e+00> : vector<24x128xf32>
    %20 = tpu.matmul %19, %18, %cst_13 {dimension_numbers = #tpu.dot_dimension_numbers<[1], [0], [0], [1], [0, 0, 1, 1], [], []>} : vector<24x64xf32>, vector<64x128xf32>, vector<24x128xf32> -> vector<24x128xf32>
    %c0_14 = arith.constant 0 : index
    %c0_15 = arith.constant 0 : index
    %21 = vector.load %arg7[%c0_14, %c0_15] : memref<24x1xf32, #tpu.memory_space<vmem>>, vector<24x1xf32>
    %22 = vector.broadcast %21 : vector<24x1xf32> to vector<24x128xf32>
    %23 = arith.addf %20, %22 : vector<24x128xf32>
    %24 = vector.extract_strided_slice %23 {offsets = [0, 0], sizes = [8, 128], strides = [1, 1]} : vector<24x128xf32> to vector<8x128xf32>
    %25 = vector.extract_strided_slice %23 {offsets = [8, 0], sizes = [8, 128], strides = [1, 1]} : vector<24x128xf32> to vector<8x128xf32>
    %26 = vector.extract_strided_slice %23 {offsets = [16, 0], sizes = [8, 128], strides = [1, 1]} : vector<24x128xf32> to vector<8x128xf32>
    %cst_16 = arith.constant dense<0xFF800000> : vector<128xf32>
    %27 = vector.multi_reduction <maximumf>, %26, %cst_16 [0] : vector<8x128xf32> to vector<128xf32>
    %28 = vector.shape_cast %27 : vector<128xf32> to vector<1x128xf32>
    %29 = vector.broadcast %28 : vector<1x128xf32> to vector<8x128xf32>
    %30 = arith.subf %26, %29 : vector<8x128xf32>
    %31 = math.exp %30 : vector<8x128xf32>
    %cst_17 = arith.constant dense<0.000000e+00> : vector<128xf32>
    %32 = vector.multi_reduction <add>, %31, %cst_17 [0] : vector<8x128xf32> to vector<128xf32>
    %33 = vector.shape_cast %32 : vector<128xf32> to vector<1x128xf32>
    %34 = tpu.reciprocal %33 {approx = true} : vector<1x128xf32> -> vector<1x128xf32>
    %35 = arith.mulf %33, %34 : vector<1x128xf32>
    %cst_18 = arith.constant 2.000000e+00 : f32
    %36 = vector.broadcast %cst_18 : f32 to vector<1x128xf32>
    %37 = arith.subf %36, %35 : vector<1x128xf32>
    %38 = arith.mulf %34, %37 : vector<1x128xf32>
    %39 = vector.broadcast %38 : vector<1x128xf32> to vector<8x128xf32>
    %40 = arith.mulf %31, %39 : vector<8x128xf32>
    %cst_19 = arith.constant 0.000000e+00 : f32
    %41 = vector.broadcast %cst_19 : f32 to vector<8x128xf32>
    %42 = arith.subf %41, %25 : vector<8x128xf32>
    %43 = math.exp %42 : vector<8x128xf32>
    %44 = vector.broadcast %1 : vector<1x128xf32> to vector<8x128xf32>
    %45 = arith.subf %44, %24 : vector<8x128xf32>
    %46 = arith.mulf %45, %43 : vector<8x128xf32>
    %cst_20 = arith.constant 0.707106769 : f32
    %47 = vector.broadcast %cst_20 : f32 to vector<8x128xf32>
    %48 = arith.mulf %46, %47 : vector<8x128xf32>
    %49 = math.erf %48 : vector<8x128xf32>
    %cst_21 = arith.constant 1.000000e+00 : f32
    %50 = vector.broadcast %cst_21 : f32 to vector<8x128xf32>
    %51 = arith.addf %50, %49 : vector<8x128xf32>
    %cst_22 = arith.constant 5.000000e-01 : f32
    %52 = vector.broadcast %cst_22 : f32 to vector<8x128xf32>
    %53 = arith.mulf %52, %51 : vector<8x128xf32>
    %54 = arith.mulf %46, %46 : vector<8x128xf32>
    %cst_23 = arith.constant -5.000000e-01 : f32
    %55 = vector.broadcast %cst_23 : f32 to vector<8x128xf32>
    %56 = arith.mulf %55, %54 : vector<8x128xf32>
    %57 = math.exp %56 : vector<8x128xf32>
    %58 = arith.mulf %57, %43 : vector<8x128xf32>
    %cst_24 = arith.constant 0.398942292 : f32
    %59 = vector.broadcast %cst_24 : f32 to vector<8x128xf32>
    %60 = arith.mulf %58, %59 : vector<8x128xf32>
    %61 = arith.mulf %53, %40 : vector<8x128xf32>
    %cst_25 = arith.constant dense<0.000000e+00> : vector<128xf32>
    %62 = vector.multi_reduction <add>, %61, %cst_25 [0] : vector<8x128xf32> to vector<128xf32>
    %63 = vector.shape_cast %62 : vector<128xf32> to vector<1x128xf32>
    %64 = arith.mulf %60, %40 : vector<8x128xf32>
    %cst_26 = arith.constant dense<0.000000e+00> : vector<128xf32>
    %65 = vector.multi_reduction <add>, %64, %cst_26 [0] : vector<8x128xf32> to vector<128xf32>
    %66 = vector.shape_cast %65 : vector<128xf32> to vector<1x128xf32>
    %67 = tpu.concatenate %63, %66 in 0 : vector<1x128xf32>, vector<1x128xf32> -> vector<2x128xf32>
    %c0_27 = arith.constant 0 : index
    %c0_28 = arith.constant 0 : index
    %68 = vector.load %arg8[%c0_27, %c0_28] : memref<2x128xf32, #tpu.memory_space<vmem>>, vector<2x128xf32>
    tpu.vector_store %arg8[%c0_27, %c0_28], %67 {strides = array<i32>} : memref<2x128xf32, #tpu.memory_space<vmem>>, vector<2x128xf32>,
    return
  }
  func.func @transform_0(%arg0: i32) -> (i32, i32) {
    %c0_i32 = arith.constant 0 : i32
    %c0_i32_0 = arith.constant 0 : i32
    return %c0_i32, %arg0 : i32, i32
  }
  func.func @transform_1(%arg0: i32) -> (i32, i32) {
    %c0_i32 = arith.constant 0 : i32
    %c0_i32_0 = arith.constant 0 : i32
    %c0_i32_1 = arith.constant 0 : i32
    return %c0_i32, %c0_i32_0 : i32, i32
  }
  func.func @transform_2(%arg0: i32) -> (i32, i32) {
    %c0_i32 = arith.constant 0 : i32
    %c0_i32_0 = arith.constant 0 : i32
    %c0_i32_1 = arith.constant 0 : i32
    return %c0_i32, %c0_i32_0 : i32, i32
  }
  func.func @transform_3(%arg0: i32) -> (i32, i32) {
    %c0_i32 = arith.constant 0 : i32
    %c0_i32_0 = arith.constant 0 : i32
    %c0_i32_1 = arith.constant 0 : i32
    return %c0_i32, %c0_i32_0 : i32, i32
  }
  func.func @transform_4(%arg0: i32) -> (i32, i32) {
    %c0_i32 = arith.constant 0 : i32
    %c0_i32_0 = arith.constant 0 : i32
    %c0_i32_1 = arith.constant 0 : i32
    return %c0_i32, %c0_i32_0 : i32, i32
  }
  func.func @transform_5(%arg0: i32) -> (i32, i32) {
    %c0_i32 = arith.constant 0 : i32
    %c0_i32_0 = arith.constant 0 : i32
    %c0_i32_1 = arith.constant 0 : i32
    return %c0_i32, %c0_i32_0 : i32, i32
  }
  func.func @transform_6(%arg0: i32) -> (i32, i32) {
    %c0_i32 = arith.constant 0 : i32
    %c0_i32_0 = arith.constant 0 : i32
    %c0_i32_1 = arith.constant 0 : i32
    return %c0_i32, %c0_i32_0 : i32, i32
  }
  func.func @transform_7(%arg0: i32) -> (i32, i32) {
    %c0_i32 = arith.constant 0 : i32
    %c0_i32_0 = arith.constant 0 : i32
    return %c0_i32, %arg0 : i32, i32
  }
}

</mosaic_0001>

<bundles_post_ra>
// kernel: tpu_custom_call.1
= control target key start
LH: loop header
LB: loop body
LE: loop exit
PB: predicated region body
PF: predicated region fallthrough
CT: control target
= control target key end

     0   :  { %12 = vsyncpa [#allocation3], 0  ;;  %s1159_s0 = inlined_call_operand.vmem [shape: f32[2,256], index: 0, kind: input, shape index: {}]   ;;  %s1160_s1 = inlined_call_operand.vmem [shape: f32[64,1], index: 1, kind: input, shape index: {}]   ;;  %s1161_s2 = inlined_call_operand.vmem [shape: f32[64,1], index: 2, kind: input, shape index: {}]   ;;  %s1162_s3 = inlined_call_operand.vmem [shape: f32[64,64], index: 3, kind: input, shape index: {}]   ;;  %s1163_s4 = inlined_call_operand.vmem [shape: f32[64,1], index: 4, kind: input, shape index: {}]   ;;  %s1164_s5 = inlined_call_operand.vmem [shape: f32[24,64], index: 5, kind: input, shape index: {}]   ;;  %s1165_s6 = inlined_call_operand.vmem [shape: f32[24,1], index: 6, kind: input, shape index: {}]   ;;  %s1166_s7 = inlined_call_operand.hbm [shape: f32[2,256], index: 7, kind: output, shape index: {}]  }
   0x1   :  { %14 = vsyncpa [#allocation3 + $0x1], 0  ;;  %s945_s24 = smov 0   ;;  %s947_s25 = smov 0  }
   0x2   :  { %s949_s26 = smov 0   ;;  %s951_s27 = smov 0  }
   0x3 LB: > { %s966_s28 = sadd.s32 4294967295, %s902_s27   ;;  %s749_s29 = sadd.s32 4294967294, %s902_s27   ;;  %s902_s27 = sphi %s951_s27, %s1172_s27   ;;  %s898_s26 = sphi %s949_s26, %s1171_s26   ;;  %s894_s25 = sphi %s947_s25, %s1170_s25   ;;  %s890_s24 = sphi %s945_s24, %s1169_s24  }
   0x4   : > { %s970_s30 = sadd.s32 1, %s902_s27   ;;  %s179_s8 = sadd.s32 1, %s898_s26 }
   0x5   : > { %s176_s9 = ssub.s32 %s902_s27, %s970_s30  ;;  %p189_p0 = scmp.ne.s32.totalorder %s898_s26, %s894_s25 }
   0x6   : > { %p177_p1 = scmp.eq.s32.totalorder %s176_s9, 0  ;;  %p190_p2 = scmp.eq.s32.totalorder %s966_s28, 1 }
   0x7   : > { %p195_p3 = scmp.ne.s32.totalorder %s894_s25, %s890_s24  ;;  %p196_p4 = scmp.eq.s32.totalorder %s749_s29, 1 }
   0x8   : > { %s981_s10 = scalar_select %p177_p1, %s898_s26, %s179_s8  }
   0x9   : > { %p983_p5 = por %p190_p2, %p189_p0  ;;  %p987_p6 = por %p196_p4, %p195_p3 }
   0xa   : > { %p752_p7 = scmp.ge.s32.totalorder %s902_s27, 1  ;;  %p239_p8 = scmp.lt.s32.totalorder %s902_s27, 3 }
   0xc   : > { %p240_p9 = pnand %p752_p7, %p239_p8 }
   0xd   : > { %p270_p10 = scmp.lt.s32.totalorder (!%p240_p9), %s966_s28, 1  ;;  %s267_s29 = sand.u32 (!%p240_p9), 1, %s894_s25  }
   0xe   : > { %243 = sbr.rel (%p240_p9) target bundleno = 564 (0x234), region = 48  ;;  %s860_s23 = scalar_lea.hbm (!%p240_p9), %s1166_s7, 4 }
  0x13   : > { %v338_v0 = vld [vmem:[%s1161_s2 + $0x30] sm:$0xff]  ;;  %v339_v1 = vld [vmem:[%s1161_s2 + $0x38] sm:$0xff]  ;;  %v904_v3 = vmov 0   ;;  %v279_v4 = vld [vmem:[%s1160_s1 + $0x20] sm:$0xff]  ;;  %s271_s8 = scalar_select %p270_p10, %s966_s28, 1  ;;  %vm452_vm0 = vcmask 523264  }
  0x14   : > { %v282_v2 = vld [vmem:[%s1160_s1 + $0x38] sm:$0xff]  ;;  %829 = vset.pattern.permute.xlu2 %v904_v3  ;;  %828 = vset.pattern.permute.xlu1 %v904_v3  ;;  %v281_v5 = vld [vmem:[%s1160_s1 + $0x30] sm:$0xff]  ;;  %v280_v6 = vld [vmem:[%s1160_s1 + $0x28] sm:$0xff]  ;;  %vm671_vm5 = vcmask 1040384  }
  0x15   : > { %827 = vset.pattern.permute.xlu0 %v904_v3  ;;  %372 = vperm.xlu2 %829, %v338_v0   ;;  %v336_v7 = vld [vmem:[%s1161_s2 + $0x20] sm:$0xff]  ;;  %v337_v8 = vld [vmem:[%s1161_s2 + $0x28] sm:$0xff]  ;;  %v278_v9 = vld [vmem:[%s1160_s1 + $0x18] sm:$0xff]  ;;  %s754_s9 = sshll.u32 %s271_s8, 1  ;;  %s753_s8 = sshll.u32 %s267_s29, 1 }
  0x16   : > { %377 = vperm.xlu1 %828, %v339_v1   ;;  %320 = vperm.xlu0 %827, %v282_v2   ;;  %v276_v10 = vld [vmem:[%s1160_s1 + $0x8] sm:$0xff]  ;;  %v335_v11 = vld [vmem:[%s1161_s2 + $0x18] sm:$0xff]  ;;  %v277_v12 = vld [vmem:[%s1160_s1 + $0x10] sm:$0xff]  ;;  %s273_s15 = scalar_lea.vmem %s1159_s0, %s754_s9  ;;  %s768_s9 = sshll.u32 %s966_s28, 1 }
  0x17   : > { %v333_v13 = vld [vmem:[%s1161_s2 + $0x8] sm:$0xff]  ;;  %v334_v14 = vld [vmem:[%s1161_s2 + $0x10] sm:$0xff]  ;;  %v275_v15 = vld [vmem:[%s1160_s1] sm:$0xff]  ;;  %s269_s16 = scalar_lea.vmem [#allocation2], %s753_s8  ;;  %s675_s28 = scalar_lea.sflag [#allocation3], %s267_s29 }
  0x18   : > { %v410_v16 = vld [vmem:[%s1163_s4 + $0x30] sm:$0xff]  ;;  %v332_v17 = vld [vmem:[%s1161_s2] sm:$0xff]  ;;  %v411_v18 = vld [vmem:[%s1163_s4 + $0x38] sm:$0xff]  ;;  %s687_s17 = sshll.u32 %s269_s16, 4  ;;  %s688_s17 = int_to_ptr.vmem [resolvable:$true] %s687_s17 }
  0x19   : > { %v407_v19 = vld [vmem:[%s1163_s4 + $0x18] sm:$0xff]  ;;  %v409_v20 = vld [vmem:[%s1163_s4 + $0x28] sm:$0xff]  ;;  %v408_v21 = vld [vmem:[%s1163_s4 + $0x20] sm:$0xff] }
  0x1a   : > { %v404_v22 = vld [vmem:[%s1163_s4] sm:$0xff]  ;;  %v406_v23 = vld [vmem:[%s1163_s4 + $0x10] sm:$0xff]  ;;  %v405_v24 = vld [vmem:[%s1163_s4 + $0x8] sm:$0xff] }
  0x1b   : > { %v531_v25 = vld [vmem:[%s1165_s6 + $0x10] sm:$0xff]  ;;  %v530_v26 = vld [vmem:[%s1165_s6 + $0x8] sm:$0xff]  ;;  %v529_v27 = vld [vmem:[%s1165_s6] sm:$0xff] }
  0x1c   : > { %v1079_v29 = vld [vmem:[%s273_s15] sm:$0x3]  ;;  %s685_s15 = scalar_lea.hbm %s1166_s7, %s768_s9 }
  0x1d   : > { %305 = vperm.xlu2 %829, %v279_v4   ;;  %v323_v30 = vperm.slane %v1079_v29, 1  ;;  %s689_s18 = sshll.u32 %s685_s15, 4  ;;  %s690_s18 = int_to_ptr.hbm [resolvable:$true] %s689_s18 }
  0x1e   : > { %315 = vperm.xlu0 %827, %v281_v5   ;;  %310 = vperm.xlu1 %828, %v280_v6   ;;  %v396_v6 = vld [vmem:[%s1162_s3] sm:$0xff]  ;;  %s854_s19 = sshra.s32 %s690_s18, 4  ;;  %s855_s19 = int_to_ptr.hbm [resolvable:$true] %s854_s19 }
  0x1f   : > { %s856_s20 = scalar_lea.hbm %s855_s19, 2  ;;  %p861_p0 = scmp.lt.s32.totalorder %s855_s19, %s1166_s7 }
  0x20   : > { %p857_p11 = scmp.ne.s32.totalorder %s855_s19, %s856_s20  ;;  %p862_p1 = scmp.lt.s32.totalorder %s860_s23, %s856_s20 }
  0x22   : > { %p858_p12 = pnand %p857_p11, %p983_p5  ;;  %p863_p2 = por %p862_p1, %p861_p0 }
  0x24   : > { %p859_p13 = pneg %p858_p12 }
  0x25   : > { %362 = vperm.xlu2 %829, %v336_v7   ;;  %v399_v7 = vld [vmem:[%s1162_s3 + $0x18] sm:$0xff] }
  0x26   : > { %367 = vperm.xlu0 %827, %v337_v8   ;;  %300 = vperm.xlu1 %828, %v278_v9   ;;  %v402_v8 = vld [vmem:[%s1162_s3 + $0x30] sm:$0xff]  ;;  %v397_v9 = vld [vmem:[%s1162_s3 + $0x8] sm:$0xff]  ;;  %p864_p3 = pnand %p863_p2, %p859_p13 }
  0x2d   : > { %290 = vperm.xlu2 %829, %v276_v10   ;;  %v400_v10 = vld [vmem:[%s1162_s3 + $0x20] sm:$0xff] }
  0x2e   : > { %357 = vperm.xlu1 %828, %v335_v11   ;;  %295 = vperm.xlu0 %827, %v277_v12   ;;  %v403_v11 = vld [vmem:[%s1162_s3 + $0x38] sm:$0xff]  ;;  %v398_v12 = vld [vmem:[%s1162_s3 + $0x10] sm:$0xff] }
  0x35   : > { %347 = vperm.xlu2 %829, %v333_v13   ;;  %v401_v13 = vld [vmem:[%s1162_s3 + $0x28] sm:$0xff] }
  0x36   : > { %352 = vperm.xlu0 %827, %v334_v14   ;;  %285 = vperm.xlu1 %828, %v275_v15  }
  0x3d   : > { %444 = vperm.xlu2 %829, %v410_v16  }
  0x3e   : > { %342 = vperm.xlu0 %827, %v332_v17   ;;  %449 = vperm.xlu1 %828, %v411_v18  }
  0x45   : > { %429 = vperm.xlu2 %829, %v407_v19  }
  0x46   : > { %439 = vperm.xlu0 %827, %v409_v20   ;;  %434 = vperm.xlu1 %828, %v408_v21  }
  0x4d   : > { %414 = vperm.xlu2 %829, %v404_v22  }
  0x4e   : > { %424 = vperm.xlu0 %827, %v406_v23   ;;  %419 = vperm.xlu1 %828, %v405_v24  }
  0x55   : > { %544 = vperm.xlu2 %829, %v531_v25  }
  0x56   : > { %539 = vperm.xlu0 %827, %v530_v26   ;;  %534 = vperm.xlu1 %828, %v529_v27  }
  0x6f   : > { %v373_v28 = vpop.permute.xlu2 %372 }
  0x77   : > { %v306_v31 = vpop.permute.xlu2 %305 }
  0x78   : > { %v328_v42 = vmul.f32 %v323_v30, %v306_v31 }
  0x7f   : > { %v363_v40 = vpop.permute.xlu2 %362 }
  0x80   : > { %v384_v47 = vadd.f32 %v363_v40, %v328_v42 }
  0x82   : > { %v392_v51 = vmax.f32 %v384_v47, 0.0  ;;  %v526_v47 = vld [vmem:[%s1164_s5] sm:$0xff] }
  0x87   : > { %v291_v50 = vpop.permute.xlu2 %290 }
  0x88   : > { %v378_v32 = vpop.permute.xlu1 %377  ;;  %v321_v33 = vpop.permute.xlu0 %320  ;;  %v325_v57 = vmul.f32 %v323_v30, %v291_v50 }
  0x89   : > { %v331_v34 = vmul.f32 %v323_v30, %v321_v33 }
  0x8b   : > { %v387_v35 = vadd.f32 %v378_v32, %v331_v34 }
  0x8d   : > { %v395_v36 = vmax.f32 %v387_v35, 0.0 }
  0x8f   : > { %485 = vmatpush.msra.mxu0 %v395_v36  ;;  %771 = vmatpush.msra.mxu2 %v395_v36  ;;  %v348_v58 = vpop.permute.xlu2 %347 }
  0x90   : > { %772 = vmatpush.msra.mxu3 %v395_v36  ;;  %v316_v37 = vpop.permute.xlu0 %315  ;;  %v311_v38 = vpop.permute.xlu1 %310  ;;  %v381_v61 = vadd.f32 %v348_v58, %v325_v57 }
  0x91   : > { %v330_v39 = vmul.f32 %v323_v30, %v316_v37  ;;  %v329_v44 = vmul.f32 %v323_v30, %v311_v38 }
  0x92   : > { %v389_v1 = vmax.f32 %v381_v61, 0.0 }
  0x93   : > { %v386_v41 = vadd.f32 %v373_v28, %v330_v39 }
  0x95   : > { %v394_v43 = vmax.f32 %v386_v41, 0.0 }
  0x97   : > { %486 = vmatpush.msra.mxu0 %v394_v43  ;;  %773 = vmatpush.msra.mxu2 %v394_v43  ;;  %v445_v18 = vpop.permute.xlu2 %444 }
  0x98   : > { %774 = vmatpush.msra.mxu3 %v394_v43  ;;  %v368_v45 = vpop.permute.xlu0 %367  ;;  %v301_v46 = vpop.permute.xlu1 %300 }
  0x99   : > { %v385_v48 = vadd.f32 %v368_v45, %v329_v44  ;;  %v327_v52 = vmul.f32 %v323_v30, %v301_v46 }
  0x9b   : > { %v393_v49 = vmax.f32 %v385_v48, 0.0  ;;  %v527_v48 = vld [vmem:[%s1164_s5 + $0x8] sm:$0xff] }
  0x9d   : > { %487 = vmatpush.msra.mxu0 %v393_v49  ;;  %775 = vmatpush.msra.mxu2 %v393_v49 }
  0x9e   : > { %776 = vmatpush.msra.mxu3 %v393_v49  ;;  %v528_v49 = vld [vmem:[%s1164_s5 + $0x10] sm:$0xff] }
  0x9f   : > { %488 = vmatpush.msra.mxu0 %v392_v51  ;;  %777 = vmatpush.msra.mxu2 %v392_v51  ;;  %v430_v28 = vpop.permute.xlu2 %429 }
  0xa0   : > { %778 = vmatpush.msra.mxu3 %v392_v51  ;;  %v358_v53 = vpop.permute.xlu1 %357  ;;  %v296_v54 = vpop.permute.xlu0 %295 }
  0xa1   : > { %v383_v55 = vadd.f32 %v358_v53, %v327_v52  ;;  %v326_v59 = vmul.f32 %v323_v30, %v296_v54 }
  0xa3   : > { %v391_v56 = vmax.f32 %v383_v55, 0.0 }
  0xa5   : > { %489 = vmatpush.msra.mxu0 %v391_v56  ;;  %779 = vmatpush.msra.mxu2 %v391_v56 }
  0xa6   : > { %780 = vmatpush.msra.mxu3 %v391_v56 }
  0xa7   : > { %v415_v42 = vpop.permute.xlu2 %414 }
  0xa8   : > { %v353_v60 = vpop.permute.xlu0 %352  ;;  %v286_v0 = vpop.permute.xlu1 %285 }
  0xa9   : > { %v382_v62 = vadd.f32 %v353_v60, %v326_v59  ;;  %v324_v2 = vmul.f32 %v323_v30, %v286_v0  ;;  %v605_v59 = vperm.slane %v1079_v29, 0 }
  0xab   : > { %v390_v63 = vmax.f32 %v382_v62, 0.0 }
  0xad   : > { %490 = vmatpush.msra.mxu0 %v390_v63  ;;  %781 = vmatpush.msra.mxu2 %v390_v63 }
  0xae   : > { %782 = vmatpush.msra.mxu3 %v390_v63 }
  0xaf   : > { %491 = vmatpush.msra.mxu0 %v389_v1  ;;  %783 = vmatpush.msra.mxu2 %v389_v1  ;;  %v545_v57 = vpop.permute.xlu2 %544 }
  0xb0   : > { %784 = vmatpush.msra.mxu3 %v389_v1  ;;  %v343_v3 = vpop.permute.xlu0 %342  ;;  %v450_v17 = vpop.permute.xlu1 %449 }
  0xb1   : > { %v380_v4 = vadd.f32 %v343_v3, %v324_v2 }
  0xb3   : > { %v388_v5 = vmax.f32 %v380_v4, 0.0 }
  0xb5   : > { %492 = vmatpush.msra.mxu0 %v388_v5  ;;  %785 = vmatpush.msra.mxu2 %v388_v5 }
  0xb6   : > { %786 = vmatpush.msra.mxu3 %v388_v5  ;;  %755 = vmatmul.msk.f32.vlgmr.msra.gmra.mxu0 %vm452_vm0, %v396_v6 }
  0xb7   : > { %758 = vmatmul.msk.f32.vlgmr.msra.gmra.mxu2 %vm452_vm0, %v399_v7  ;;  %761 = vmatmul.msk.f32.vlgmr.msra.gmra.mxu3 %vm452_vm0, %v402_v8 }
  0xb8   : > { %v440_v24 = vpop.permute.xlu0 %439  ;;  %v435_v26 = vpop.permute.xlu1 %434 }
  0xbe   : > { %756 = vmatmul.msk.f32.gmra.mxu0 %vm452_vm0, %v397_v9 }
  0xbf   : > { %759 = vmatmul.msk.f32.gmra.mxu2 %vm452_vm0, %v400_v10  ;;  %762 = vmatmul.msk.f32.gmra.mxu3 %vm452_vm0, %v403_v11 }
  0xc0   : > { %v425_v36 = vpop.permute.xlu0 %424  ;;  %v420_v39 = vpop.permute.xlu1 %419 }
  0xc6   : > { %757 = vmatmul.msk.f32.gmra.mxu0 %vm452_vm0, %v398_v12 }
  0xc7   : > { %760 = vmatmul.msk.f32.gmra.mxu2 %vm452_vm0, %v401_v13 }
  0xc8   : > { %v540_v51 = vpop.permute.xlu0 %539  ;;  %v535_v56 = vpop.permute.xlu1 %534 }
 0x133   : > { %v494_v14 = vpop.f32.mrf.mxu0 }
 0x134   : > { %v495_v43 = vadd.f32 %v494_v14, %v415_v42 }
 0x136   : > { %v518_v46 = vmax.f32 %v495_v43, 0.0 }
 0x13a   : > { %v503_v15 = vpop.f32.mrf.mxu2  ;;  %v512_v16 = vpop.f32.mrf.mxu3 }
 0x13b   : > { %v497_v19 = vpop.f32.mrf.mxu0  ;;  %v513_v22 = vadd.f32 %v512_v16, %v445_v18  ;;  %v504_v34 = vadd.f32 %v503_v15, %v430_v28 }
 0x13c   : > { %v498_v41 = vadd.f32 %v497_v19, %v420_v39 }
 0x13d   : > { %v524_v27 = vmax.f32 %v513_v22, 0.0  ;;  %v521_v40 = vmax.f32 %v504_v34, 0.0 }
 0x13e   : > { %v519_v45 = vmax.f32 %v498_v41, 0.0 }
 0x142   : > { %v506_v20 = vpop.f32.mrf.mxu2  ;;  %v515_v21 = vpop.f32.mrf.mxu3 }
 0x143   : > { %v516_v23 = vadd.f32 %v515_v21, %v450_v17  ;;  %v507_v31 = vadd.f32 %v506_v20, %v435_v26  ;;  %v500_v33 = vpop.f32.mrf.mxu0 }
 0x144   : > { %v501_v38 = vadd.f32 %v500_v33, %v425_v36 }
 0x145   : > { %v525_v25 = vmax.f32 %v516_v23, 0.0  ;;  %v522_v37 = vmax.f32 %v507_v31, 0.0 }
 0x146   : > { %v520_v44 = vmax.f32 %v501_v38, 0.0 }
 0x147   : > { %564 = vmatpush.msra.mxu1 %v525_v25 }
 0x149   : > { %565 = vmatpush.msra.mxu1 %v524_v27 }
 0x14a   : > { %v509_v30 = vpop.f32.mrf.mxu2 }
 0x14b   : > { %v510_v32 = vadd.f32 %v509_v30, %v440_v24 }
 0x14d   : > { %v523_v35 = vmax.f32 %v510_v32, 0.0 }
 0x14f   : > { %566 = vmatpush.msra.mxu1 %v523_v35 }
 0x151   : > { %567 = vmatpush.msra.mxu1 %v522_v37 }
 0x153   : > { %568 = vmatpush.msra.mxu1 %v521_v40 }
 0x155   : > { %569 = vmatpush.msra.mxu1 %v520_v44 }
 0x157   : > { %570 = vmatpush.msra.mxu1 %v519_v45 }
 0x159   : > { %571 = vmatpush.msra.mxu1 %v518_v46 }
 0x15a   : > { %763 = vmatmul.msk.f32.vlgmr.msra.gmra.mxu1 %vm452_vm0, %v526_v47 }
 0x162   : > { %764 = vmatmul.msk.f32.gmra.mxu1 %vm452_vm0, %v527_v48 }
 0x16a   : > { %765 = vmatmul.msk.f32.gmra.mxu1 %vm452_vm0, %v528_v49 }
 0x1d7   : > { %v573_v50 = vpop.f32.mrf.mxu1 }
 0x1d8   : > { %v574_v58 = vadd.f32 %v573_v50, %v535_v56 }
 0x1da   : > { %v606_v63 = vsub.f32 %v605_v59, %v574_v58 }
 0x1df   : > { %v576_v52 = vpop.f32.mrf.mxu1 }
 0x1e0   : > { %v577_v53 = vadd.f32 %v576_v52, %v540_v51 }
 0x1e2   : > { %v602_v54 = vsub.f32 0.0, %v577_v53 }
 0x1e4   : > { %v603_v55 = vmul.f32 1.442695, %v602_v54 }
 0x1e6   : > { %830 = vpow2.f32 %v603_v55 }
 0x1e7   : > { %v579_v60 = vpop.f32.mrf.mxu1 }
 0x1e8   : > { %v580_v61 = vadd.f32 %v579_v60, %v545_v57 }
 0x1ea   : > { %v582_v62 = vrot.slane %v580_v61, 4 }
 0x1ec   : > { %v831_v0 = vpop.eup %830  ;;  %v583_v1 = vmax.f32 %v580_v61, %v582_v62 }
 0x1ed   : > { %v607_v2 = vmul.f32 %v831_v0, %v606_v63 }
 0x1ee   : > { %v584_v3 = vrot.slane %v583_v1, 2 }
 0x1ef   : > { %v608_v4 = vmul.f32 0.70710677, %v607_v2  ;;  %v651_v24 = vmul.f32 %v607_v2, %v607_v2 }
 0x1f0   : > { %v585_v5 = vmax.f32 %v583_v1, %v584_v3 }
 0x1f1   : > { %v609_v6 = vmul.f32 %v608_v4, %v608_v4  ;;  %v652_v31 = vmul.f32 -0.5, %v651_v24 }
 0x1f2   : > { %v586_v7 = vrot.slane %v585_v5, 1 }
 0x1f3   : > { %v610_v8 = vmin.f32 %v609_v6, 16.0  ;;  %v653_v36 = vmul.f32 1.442695, %v652_v31 }
 0x1f4   : > { %v587_v9 = vmax.f32 %v585_v5, %v586_v7 }
 0x1f5   : > { %v611_v10 = vmul.f32 2.1237322e-06, %v610_v8  ;;  %v622_v11 = vmul.f32 3.8918573e-05, %v610_v8 }
 0x1f6   : > { %v588_v12 = vsub.f32 %v580_v61, %v587_v9 }
 0x1f7   : > { %v612_v13 = vadd.f32 0.00028619796, %v611_v10  ;;  %v623_v14 = vadd.f32 0.001143296, %v622_v11 }
 0x1f8   : > { %v589_v29 = vmul.f32 1.442695, %v588_v12 }
 0x1f9   : > { %v613_v15 = vmul.f32 %v612_v13, %v610_v8  ;;  %v624_v16 = vmul.f32 %v623_v14, %v610_v8 }
 0x1fa   : > { %832 = vpow2.f32 %v589_v29 }
 0x1fb   : > { %v625_v17 = vadd.f32 0.014752088, %v624_v16  ;;  %v614_v18 = vadd.f32 0.0036580483, %v613_v15 }
 0x1fd   : > { %v626_v19 = vmul.f32 %v625_v17, %v610_v8  ;;  %v615_v22 = vmul.f32 %v614_v18, %v610_v8 }
 0x1ff   : > { %v627_v20 = vadd.f32 0.112945676, %v626_v19  ;;  %v616_v28 = vadd.f32 0.05243302, %v615_v22 }
 0x200   : > { %v833_v21 = vpop.eup %832 }
 0x201   : > { %v628_v23 = vmul.f32 %v627_v20, %v610_v8  ;;  %v591_v25 = vrot.slane %v833_v21, 4  ;;  %v617_v35 = vmul.f32 %v616_v28, %v610_v8 }
 0x203   : > { %v629_v26 = vadd.f32 0.4994258, %v628_v23  ;;  %v592_v27 = vadd.f32 %v833_v21, %v591_v25  ;;  %v618_v38 = vadd.f32 0.18741608, %v617_v35 }
 0x205   : > { %v630_v30 = vmul.f32 %v629_v26, %v610_v8  ;;  %v593_v32 = vrot.slane %v592_v27, 2  ;;  %v619_v41 = vmul.f32 %v618_v38, %v610_v8 }
 0x207   : > { %v631_v33 = vadd.f32 1.0, %v630_v30  ;;  %v594_v34 = vadd.f32 %v593_v32, %v592_v27  ;;  %v620_v47 = vadd.f32 1.1283791, %v619_v41 }
 0x209   : > { %834 = vrcp.f32 %v631_v33  ;;  %v595_v37 = vrot.slane %v594_v34, 1  ;;  %v643_v45 = vand.u32 2147483648, %v631_v33  ;;  %v641_v49 = vand.u32 2147483647, %v631_v33 }
 0x20a   : > { %836 = vpow2.f32 %v653_v36  ;;  %vm637_vm2 = vweird.f32 %v631_v33  ;;  %v621_v55 = vmul.f32 %v620_v47, %v608_v4 }
 0x20b   : > { %v596_v39 = vadd.f32 %v595_v37, %v594_v34  ;;  %v644_v52 = vor.u32 1.1754944e-38, %v643_v45  ;;  %vm642_vm4 = vcmp.eq.f32.partialorder %v641_v49, 8.507059e+37 }
 0x20d   : > { %838 = vrcp.f32 %v596_v39 }
 0x20f   : > { %v835_v40 = vpop.eup %834 }
 0x210   : > { %v633_v42 = vmul.f32 %v835_v40, %v631_v33  ;;  %v837_v44 = vpop.eup %836  ;;  %vm638_vm1 = vweird.f32 %v835_v40 }
 0x211   : > { %vm639_vm3 = vmor %vm637_vm2, %vm638_vm1  ;;  %v655_v53 = vmul.f32 %v837_v44, %v831_v0 }
 0x212   : > { %v634_v43 = vsub.f32 1.0, %v633_v42 }
 0x213   : > { %v839_v46 = vpop.eup %838  ;;  %v656_v60 = vmul.f32 0.3989423, %v655_v53 }
 0x214   : > { %v635_v48 = vmul.f32 %v835_v40, %v634_v43  ;;  %v598_v50 = vmul.f32 %v839_v46, %v596_v39 }
 0x216   : > { %v636_v51 = vadd.f32 %v835_v40, %v635_v48  ;;  %v599_v54 = vsub.f32 2.0, %v598_v50 }
 0x218   : > { %v640_v56 = vsel %vm639_vm3, %v835_v40, %v636_v51  ;;  %v600_v58 = vmul.f32 %v839_v46, %v599_v54 }
 0x219   : > { %v645_v57 = vsel %vm642_vm4, %v644_v52, %v640_v56 }
 0x21a   : > { %v646_v59 = vmul.f32 %v645_v57, %v621_v55  ;;  %v601_v61 = vmul.f32 %v833_v21, %v600_v58 }
 0x21c   : > { %v766_v62 = vclamps-f32 %v646_v59, 1.0  ;;  %v664_v63 = vmul.f32 %v656_v60, %v601_v61 }
 0x21e   : > { %v649_v1 = vadd.f32 1.0, %v766_v62  ;;  %v665_v2 = vrot.slane %v664_v63, 4 }
 0x220   : > { %v650_v3 = vmul.f32 0.5, %v649_v1  ;;  %v666_v5 = vadd.f32 %v665_v2, %v664_v63 }
 0x222   : > { %v657_v6 = vmul.f32 %v650_v3, %v601_v61  ;;  %v667_v0 = vrot.slane %v666_v5, 2 }
 0x224   : > { %v658_v7 = vrot.slane %v657_v6, 4  ;;  %v668_v8 = vadd.f32 %v667_v0, %v666_v5 }
 0x226   : > { %v659_v4 = vadd.f32 %v658_v7, %v657_v6  ;;  %v669_v11 = vrot.slane %v668_v8, 1 }
 0x228   : > { %v660_v9 = vrot.slane %v659_v4, 2  ;;  %v670_v14 = vadd.f32 %v669_v11, %v668_v8 }
 0x22a   : > { %v661_v10 = vadd.f32 %v660_v9, %v659_v4 }
 0x22c   : > { %v662_v12 = vrot.slane %v661_v10, 1 }
 0x22e   : > { %v663_v13 = vadd.f32 %v662_v12, %v661_v10 }
 0x230   : > { %v672_v29 = vsel %vm671_vm5, %v663_v13, %v670_v14 }
 0x231   : > { %673 = vst [vmem:[%s269_s16] sm:$0x3] %v672_v29 }
 0x232   : > { %867 = shalt.err (!%p864_p3)
}
 0x233   : > { %787 = dma.vmem_to_hbm [thread:$0]  (%p983_p5), %s688_s17, 32, %s690_s18, %s675_s28  }
 0x234 PF: > { %p793_p4 = scmp.ge.s32.totalorder %s902_s27, 2  ;;  %s701_s29 = sand.u32 1, %s890_s24  }
 0x235   : > { %s702_s13 = scalar_lea.sflag [#allocation3], %s701_s29 }
 0x236   : > { %p790_p7 = pnand %p793_p4, %p987_p6 }
 0x238   : > { %p791_p8 = pneg %p790_p7 }
 0x23a   : > { %885 = dma.done.wait (%p791_p8), %s702_s13, 32  }
 0x23b   : > { %887 = vsyncadd (%p791_p8), %s702_s13, 4294967264  ;;  %p17_p9 = scmp.ge.s32.totalorder %s970_s30, 4   ;;  %s1169_s24 = smov %s894_s25 }
 0x23c   : > { %s1170_s25 = smov %s898_s26  ;;  %s1171_s26 = smov %s981_s10 }
 0x23d   : > { %s1172_s27 = smov %s970_s30  ;;  %19 = sbr.rel (!%p17_p9) target bundleno = 3 (0x3), region = 83 }
 0x242   :  { %708 = vsyncpa [#allocation3], 1 }
 0x243   :  { %710 = vsyncpa [#allocation3 + $0x1], 1 }

</bundles_post_ra>
